<compile_context>
chip_gen: v7x
topology: tpu7x:2x2x1
jax: 0.10.0
libtpu: 0.0.40
codegen_flags: <defaults>
</compile_context>

<pallas_src>
import functools

import jax
import jax.numpy as jnp
from jax.experimental import pallas as pl
from jax.experimental.pallas import tpu as pltpu


_MISC = 128                     # lattice-ips (9) + frac_diff (3) lanes, padded to one lane tile
_VMEM_LIMIT = 48 * 1024 * 1024  # safe on v5e/v6e (128 MiB) and v7x (64 MiB physical)


def _round_up(x, m):
    return (x + m - 1) // m * m


def _silu(x):
    # x * sigmoid(x); reciprocal goes to the EUP slot (approx is fine at bf16 matmul precision)
    return x * pl.reciprocal(1.0 + jnp.exp(-x), approx=True)


# ---------------------------------------------------------------------------
# Fused kernel (grid over edge tiles, reduction axis "arbitrary"):
#   ef    = SiLU(SiLU([hi|hj|misc] @ W1 + b1) @ W2 + b2)          (edge MLP)
#   agg  += onehot(src)*inv @ ef                                   (scatter_mean, resident fp32)
#   last tile: out = nf + SiLU(SiLU(nf@W1a + agg@W1b + b1) @ W2 + b2)
# ---------------------------------------------------------------------------
def csp_fused_kernel(edges_ref, inv_ref, src_ref,
                     ew1_ref, eb1_ref, ew2_ref, eb2_ref,
                     nf_ref, nw1_nf_ref, nw1_ag_ref, nb1_ref, nw2_ref, nb2_ref,
                     o_ref, agg_ref):
    e = pl.program_id(0)

    @pl.when(e == 0)
    def _init():
        agg_ref[...] = jnp.zeros_like(agg_ref)

    # ---- edge MLP: single K = 2*H_pad + _MISC matmul (full MXU depth on v6e/v7x) ----
    h = jnp.dot(edges_ref[...], ew1_ref[...],
                preferred_element_type=jnp.float32) + eb1_ref[...]
    h = _silu(h)
    ef = jnp.dot(h.astype(jnp.bfloat16), ew2_ref[...],
                 preferred_element_type=jnp.float32) + eb2_ref[...]
    ef = _silu(ef).astype(jnp.bfloat16)

    # ---- scatter_mean via one-hot matmul into the VMEM-resident accumulator ----
    # 1/count(src) is folded into the one-hot (lane-dense (1, TE) input).  Padded
    # edges carry inv == 0, so they contribute exactly zero regardless of src id
    # (do NOT remove this scaling without adding an explicit edge-validity mask).
    n_pad = agg_ref.shape[0]
    te = edges_ref.shape[0]
    row_ids = jax.lax.broadcasted_iota(jnp.int32, (n_pad, te), 0)
    onehot = jnp.where(row_ids == src_ref[...], inv_ref[...], 0.0).astype(jnp.bfloat16)
    agg_ref[...] += jnp.dot(onehot, ef, preferred_element_type=jnp.float32)

    # ---- epilogue on the last edge tile: node MLP + residual, straight to output ----
    @pl.when(e == pl.num_programs(0) - 1)
    def _fin():
        nf = nf_ref[...]                                   # fp32; reused for residual
        hn = (jnp.dot(nf.astype(jnp.bfloat16), nw1_nf_ref[...],
                      preferred_element_type=jnp.float32)
              + jnp.dot(agg_ref[...].astype(jnp.bfloat16), nw1_ag_ref[...],
                        preferred_element_type=jnp.float32)
              + nb1_ref[...])
        hn = _silu(hn)
        h2 = jnp.dot(hn.astype(jnp.bfloat16), nw2_ref[...],
                     preferred_element_type=jnp.float32) + nb2_ref[...]
        o_ref[...] = nf + _silu(h2)


# ---------------------------------------------------------------------------
# One-time weight prep: pad / cast / stack (hoisted out of the per-call path)
# ---------------------------------------------------------------------------
def prepare_params(params):
    H = params["edge_w2"].shape[0]
    H_pad = _round_up(H, 128)
    K_pad = 2 * H_pad + _MISC

    def pad2(a, rows, cols, dtype):
        out = jnp.zeros((rows, cols), dtype)
        return out.at[:a.shape[0], :a.shape[1]].set(a.astype(dtype))

    ew1 = params["edge_w1"]                       # [2H + 9 + 3, H]
    misc_rows = ew1.shape[0] - 2 * H              # 12
    # stacked W1 whose row blocks line up with the concatenated [hi | hj | misc] layout
    ew1_s = jnp.zeros((K_pad, H_pad), jnp.bfloat16)
    ew1_s = ew1_s.at[:H, :H].set(ew1[:H].astype(jnp.bfloat16))
    ew1_s = ew1_s.at[H_pad:H_pad + H, :H].set(ew1[H:2 * H].astype(jnp.bfloat16))
    ew1_s = ew1_s.at[2 * H_pad:2 * H_pad + misc_rows, :H].set(
        ew1[2 * H:].astype(jnp.bfloat16))

    nw1 = params["node_w1"]                       # [2H, H]
    return {
        "ew1": ew1_s,
        "eb1": pad2(params["edge_b1"], 1, H_pad, jnp.float32),
        "ew2": pad2(params["edge_w2"], H_pad, H_pad, jnp.bfloat16),
        "eb2": pad2(params["edge_b2"], 1, H_pad, jnp.float32),
        "nw1_nf": pad2(nw1[:H], H_pad, H_pad, jnp.bfloat16),
        "nw1_ag": pad2(nw1[H:], H_pad, H_pad, jnp.bfloat16),
        "nb1": pad2(params["node_b1"], 1, H_pad, jnp.float32),
        "nw2": pad2(params["node_w2"], H_pad, H_pad, jnp.bfloat16),
        "nb2": pad2(params["node_b2"], 1, H_pad, jnp.float32),
    }


# ---------------------------------------------------------------------------
# CSPLayer forward (ln=False, dis_emb=None, ip=True)
# ---------------------------------------------------------------------------
@functools.partial(jax.jit, static_argnames=("te_max",))
def csp_layer_forward(prep, node_features, frac_coords, lattices,
                      edge_index, edge2graph, *, te_max=1024):
    N, H = node_features.shape
    E = edge_index.shape[1]
    H_pad = _round_up(H, 128)
    K_pad = 2 * H_pad + _MISC
    N_pad = _round_up(N, 8)
    TE = min(te_max, _round_up(E, 128))           # edge-row tile (multiple of 128)
    E_pad = _round_up(E, TE)
    num_e_tiles = E_pad // TE

    src = edge_index[0].astype(jnp.int32)
    dst = edge_index[1].astype(jnp.int32)

    # padded edges point at node 0 -> finite garbage, cancelled by inv == 0 in-kernel
    src_full = jnp.zeros((E_pad,), jnp.int32).at[:E].set(src)
    dst_full = jnp.zeros((E_pad,), jnp.int32).at[:E].set(dst)
    e2g_full = jnp.zeros((E_pad,), jnp.int32).at[:E].set(edge2graph.astype(jnp.int32))

    # node features padded once (rows -> N_pad, lanes -> H_pad); bf16 copy feeds gathers
    nf_p = jnp.zeros((N_pad, H_pad), jnp.float32).at[:N, :H].set(node_features)
    nf_bf = nf_p.astype(jnp.bfloat16)

    hi = jnp.take(nf_bf, src_full, axis=0)                          # [E_pad, H_pad] bf16
    hj = jnp.take(nf_bf, dst_full, axis=0)                          # [E_pad, H_pad] bf16

    frac_diff = (jnp.take(frac_coords, dst_full, axis=0)
                 - jnp.take(frac_coords, src_full, axis=0)) % 1.0   # [E_pad, 3]
    lattice_ips = lattices @ jnp.swapaxes(lattices, -1, -2)         # [G, 3, 3]  (ip=True)
    lat_edges = jnp.take(lattice_ips.reshape(-1, 9), e2g_full, axis=0)  # [E_pad, 9]

    # single concatenated bf16 edge input [hi | hj | lattice+frac (lane-padded)]
    edges_in = jnp.concatenate(
        [hi, hj,
         lat_edges.astype(jnp.bfloat16),
         frac_diff.astype(jnp.bfloat16),
         jnp.zeros((E_pad, _MISC - 12), jnp.bfloat16)], axis=1)     # [E_pad, K_pad]

    # scatter_mean normalisation: per-edge 1/count(src), lane-dense, zero on padded edges
    cnt = jax.ops.segment_sum(jnp.ones((E,), jnp.float32), src, num_segments=N)
    inv_e = 1.0 / jnp.maximum(jnp.take(cnt, src), 1.0)              # [E]
    inv_p = jnp.zeros((1, E_pad), jnp.float32).at[0, :E].set(inv_e)
    src_p = jnp.zeros((1, E_pad), jnp.int32).at[0, :E].set(src)

    flops = int(2 * E_pad * K_pad * H_pad           # edge W1
                + 2 * E_pad * H_pad * H_pad         # edge W2
                + 2 * N_pad * E_pad * H_pad         # one-hot scatter
                + 2 * N_pad * (2 * H_pad) * H_pad   # node W1
                + 2 * N_pad * H_pad * H_pad)        # node W2
    transcend = int(2 * E_pad * H_pad + 2 * N_pad * H_pad)
    bytes_acc = int(E_pad * K_pad * 2 + E_pad * 8
                    + (K_pad * H_pad + 3 * H_pad * H_pad) * 2 + 5 * H_pad * 4
                    + 2 * N_pad * H_pad * 4)

    def wspec(shape):
        return pl.BlockSpec(shape, lambda e: (0, 0))   # VMEM-resident (constant index_map)

    out = pl.pallas_call(
        csp_fused_kernel,
        out_shape=jax.ShapeDtypeStruct((N_pad, H_pad), jnp.float32),
        grid=(num_e_tiles,),
        in_specs=[
            pl.BlockSpec((TE, K_pad), lambda e: (e, 0)),   # concatenated edge inputs
            pl.BlockSpec((1, TE), lambda e: (0, e)),       # 1/count(src), lane-dense
            pl.BlockSpec((1, TE), lambda e: (0, e)),       # src ids, lane-dense
            wspec((K_pad, H_pad)),                         # stacked edge W1
            wspec((1, H_pad)),                             # edge b1
            wspec((H_pad, H_pad)),                         # edge W2
            wspec((1, H_pad)),                             # edge b2
            wspec((N_pad, H_pad)),                         # node features (fp32, resident)
            wspec((H_pad, H_pad)),                         # node W1 (nf rows)
            wspec((H_pad, H_pad)),                         # node W1 (agg rows)
            wspec((1, H_pad)),                             # node b1
            wspec((H_pad, H_pad)),                         # node W2
            wspec((1, H_pad)),                             # node b2
        ],
        out_specs=pl.BlockSpec((N_pad, H_pad), lambda e: (0, 0)),   # written on last tile
        scratch_shapes=[pltpu.VMEM((N_pad, H_pad), jnp.float32)],   # resident fp32 agg
        compiler_params=pltpu.CompilerParams(
            dimension_semantics=("arbitrary",),
            vmem_limit_bytes=_VMEM_LIMIT),
        cost_estimate=pl.CostEstimate(flops=flops, transcendentals=transcend,
                                      bytes_accessed=bytes_acc),
    )(edges_in, inv_p, src_p,
      prep["ew1"], prep["eb1"], prep["ew2"], prep["eb2"],
      nf_p, prep["nw1_nf"], prep["nw1_ag"], prep["nb1"], prep["nw2"], prep["nb2"])

    return out[:N, :H]


# ---------------------------------------------------------------------------
# Pure-JAX fp32 reference (true module semantics) for verification
# ---------------------------------------------------------------------------
def csp_layer_reference(params, node_features, frac_coords, lattices,
                        edge_index, edge2graph):
    N, H = node_features.shape
    src, dst = edge_index[0], edge_index[1]
    hi, hj = node_features[src], node_features[dst]
    frac_diff = (frac_coords[dst] - frac_coords[src]) % 1.0
    lat_flat = (lattices @ jnp.swapaxes(lattices, -1, -2)).reshape(-1, 9)
    edges_input = jnp.concatenate([hi, hj, lat_flat[edge2graph], frac_diff], axis=1)

    def silu(x):
        return x * jax.nn.sigmoid(x)

    ef = silu(edges_input @ params["edge_w1"] + params["edge_b1"])
    ef = silu(ef @ params["edge_w2"] + params["edge_b2"])

    agg_sum = jax.ops.segment_sum(ef, src, num_segments=N)
    cnt = jax.ops.segment_sum(jnp.ones((src.shape[0],), jnp.float32), src,
                              num_segments=N)
    agg = agg_sum / jnp.maximum(cnt, 1.0)[:, None]
    h = silu(jnp.concatenate([node_features, agg], axis=1) @ params["node_w1"]
             + params["node_b1"])
    h = silu(h @ params["node_w2"] + params["node_b2"])
    return node_features + h


# ---------------------------------------------------------------------------
def init_params(key, hidden_dim, dis_dim=3):
    ks = jax.random.split(key, 8)
    d_in_edge = hidden_dim * 2 + 9 + dis_dim
    s = lambda fan_in: 1.0 / jnp.sqrt(jnp.float32(fan_in))
    return {
        "edge_w1": jax.random.normal(ks[0], (d_in_edge, hidden_dim), jnp.float32) * s(d_in_edge),
        "edge_b1": jax.random.normal(ks[1], (1, hidden_dim), jnp.float32) * 0.01,
        "edge_w2": jax.random.normal(ks[2], (hidden_dim, hidden_dim), jnp.float32) * s(hidden_dim),
        "edge_b2": jax.random.normal(ks[3], (1, hidden_dim), jnp.float32) * 0.01,
        "node_w1": jax.random.normal(ks[4], (2 * hidden_dim, hidden_dim), jnp.float32) * s(2 * hidden_dim),
        "node_b1": jax.random.normal(ks[5], (1, hidden_dim), jnp.float32) * 0.01,
        "node_w2": jax.random.normal(ks[6], (hidden_dim, hidden_dim), jnp.float32) * s(hidden_dim),
        "node_b2": jnp.zeros((1, hidden_dim), jnp.float32),
    }


def _make_inputs(key, N, E, H, G):
    k_nf, k_fc, k_lat, k_ei = jax.random.split(key, 4)
    node_features = jax.random.normal(k_nf, (N, H), jnp.float32)
    frac_coords = jax.random.uniform(k_fc, (N, 3), jnp.float32)
    lattices = jax.random.normal(k_lat, (G, 3, 3), jnp.float32)
    edge_index = jax.random.randint(k_ei, (2, E), 0, N, jnp.int32)
    node2graph = (jnp.arange(N) * G // N).astype(jnp.int32)
    edge2graph = node2graph[edge_index[0]]
    return node_features, frac_coords, lattices, edge_index, edge2graph


if __name__ == "__main__":
    key = jax.random.PRNGKey(0)
    k_in1, k_in2, k_params = jax.random.split(key, 3)

    H = 32
    params = init_params(k_params, H)
    prep = prepare_params(params)

    # --- small demo (module-consistent shapes) ---
    N, E, G = 8, 16, 2
    nf, fc, lat, ei, e2g = _make_inputs(k_in1, N, E, H, G)
    out = csp_layer_forward(prep, nf, fc, lat, ei, e2g)
    out = jax.block_until_ready(out)
    ref = csp_layer_reference(params, nf, fc, lat, ei, e2g)
    assert out.shape == (N, H)
    # bf16 MXU matmuls vs fp32 reference -> loosened tolerance
    assert jnp.allclose(out, ref, atol=1e-1, rtol=1e-1), "mismatch vs reference (small)"

    # --- multi-tile check: forces the E-reduction accumulation across 3 edge tiles ---
    N2, E2, G2 = 24, 640, 2
    nf2, fc2, lat2, ei2, e2g2 = _make_inputs(k_in2, N2, E2, H, G2)
    out2 = csp_layer_forward(prep, nf2, fc2, lat2, ei2, e2g2, te_max=256)
    out2 = jax.block_until_ready(out2)
    ref2 = csp_layer_reference(params, nf2, fc2, lat2, ei2, e2g2)
    assert out2.shape == (N2, H)
    assert jnp.allclose(out2, ref2, atol=1e-1, rtol=1e-1), "mismatch vs reference (multi-tile)"

    print("KERNEL_OK")
</pallas_src>

<mosaic_0001>
module attributes {stable_mosaic.version = 11 : i64} {
  func.func private @main(%arg0: i32) attributes {dimension_semantics = [#tpu.dimension_semantics<core_parallel>], iteration_bounds = array<i64: 2>, tpu.core_type = #tpu.core_type<sc_scalar_subcore>, window_params = []} {
    return
  }
}

module attributes {stable_mosaic.version = 11 : i64} {
  func.func private @main(%arg0: i32) attributes {dimension_semantics = [#tpu.dimension_semantics<core_parallel>], iteration_bounds = array<i64: 2>, tpu.core_type = #tpu.core_type<sc_scalar_subcore>, window_params = []} {
    return
  }
}

module attributes {stable_mosaic.version = 11 : i64} {
  func.func @csp_fused_kernel(%arg0: i32, %arg1: memref<128x384xbf16, #tpu.memory_space<vmem>>, %arg2: memref<1x128xf32, #tpu.memory_space<vmem>>, %arg3: memref<1x128xi32, #tpu.memory_space<vmem>>, %arg4: memref<384x128xbf16, #tpu.memory_space<vmem>>, %arg5: memref<1x128xf32, #tpu.memory_space<vmem>>, %arg6: memref<128x128xbf16, #tpu.memory_space<vmem>>, %arg7: memref<1x128xf32, #tpu.memory_space<vmem>>, %arg8: memref<8x128xf32, #tpu.memory_space<vmem>>, %arg9: memref<128x128xbf16, #tpu.memory_space<vmem>>, %arg10: memref<128x128xbf16, #tpu.memory_space<vmem>>, %arg11: memref<1x128xf32, #tpu.memory_space<vmem>>, %arg12: memref<128x128xbf16, #tpu.memory_space<vmem>>, %arg13: memref<1x128xf32, #tpu.memory_space<vmem>>, %arg14: memref<8x128xf32, #tpu.memory_space<vmem>>, %arg15: memref<8x128xf32, #tpu.memory_space<vmem>>) attributes {dimension_semantics = [#tpu.dimension_semantics<arbitrary>], iteration_bounds = array<i64: 1>, scalar_prefetch = 0 : i64, scratch_operands = 1 : i64, tpu.core_type = #tpu.core_type<tc>, window_params = [{transform_indices = @transform_0, window_bounds = array<i64: 128, 384>}, {transform_indices = @transform_1, window_bounds = array<i64: 1, 128>}, {transform_indices = @transform_2, window_bounds = array<i64: 1, 128>}, {pipeline_mode = #tpu.pipeline_mode<synchronous>, transform_indices = @transform_3, window_bounds = array<i64: 384, 128>}, {pipeline_mode = #tpu.pipeline_mode<synchronous>, transform_indices = @transform_4, window_bounds = array<i64: 1, 128>}, {pipeline_mode = #tpu.pipeline_mode<synchronous>, transform_indices = @transform_5, window_bounds = array<i64: 128, 128>}, {pipeline_mode = #tpu.pipeline_mode<synchronous>, transform_indices = @transform_6, window_bounds = array<i64: 1, 128>}, {pipeline_mode = #tpu.pipeline_mode<synchronous>, transform_indices = @transform_7, window_bounds = array<i64: 8, 128>}, {pipeline_mode = #tpu.pipeline_mode<synchronous>, transform_indices = @transform_8, window_bounds = array<i64: 128, 128>}, {pipeline_mode = #tpu.pipeline_mode<synchronous>, transform_indices = @transform_9, window_bounds = array<i64: 128, 128>}, {pipeline_mode = #tpu.pipeline_mode<synchronous>, transform_indices = @transform_10, window_bounds = array<i64: 1, 128>}, {pipeline_mode = #tpu.pipeline_mode<synchronous>, transform_indices = @transform_11, window_bounds = array<i64: 128, 128>}, {pipeline_mode = #tpu.pipeline_mode<synchronous>, transform_indices = @transform_12, window_bounds = array<i64: 1, 128>}, {pipeline_mode = #tpu.pipeline_mode<synchronous>, transform_indices = @transform_13, window_bounds = array<i64: 8, 128>}]} {
    %c0_i32 = arith.constant 0 : i32
    %0 = arith.cmpi eq, %arg0, %c0_i32 : i32
    %1 = arith.extui %0 : i1 to i32
    %c0_i32_0 = arith.constant 0 : i32
    %2 = arith.cmpi ne, %1, %c0_i32_0 : i32
    scf.if %2 {
      %cst_27 = arith.constant 0.000000e+00 : f32
      %47 = vector.broadcast %cst_27 : f32 to vector<8x128xf32>
      %c0_28 = arith.constant 0 : index
      %c0_29 = arith.constant 0 : index
      %48 = vector.load %arg15[%c0_28, %c0_29] : memref<8x128xf32, #tpu.memory_space<vmem>>, vector<8x128xf32>
      tpu.vector_store %arg15[%c0_28, %c0_29], %47 {strides = array<i32>} : memref<8x128xf32, #tpu.memory_space<vmem>>, vector<8x128xf32>,
    } else {
    }
    %c0 = arith.constant 0 : index
    %c0_1 = arith.constant 0 : index
    %3 = vector.load %arg1[%c0, %c0_1] : memref<128x384xbf16, #tpu.memory_space<vmem>>, vector<128x384xbf16>
    %c0_2 = arith.constant 0 : index
    %c0_3 = arith.constant 0 : index
    %4 = vector.load %arg4[%c0_2, %c0_3] : memref<384x128xbf16, #tpu.memory_space<vmem>>, vector<384x128xbf16>
    %cst = arith.constant dense<0.000000e+00> : vector<128x128xf32>
    %5 = tpu.matmul %3, %4, %cst {dimension_numbers = #tpu.dot_dimension_numbers<[1], [0], [0], [1], [0, 0, 1, 1], [], []>} : vector<128x384xbf16>, vector<384x128xbf16>, vector<128x128xf32> -> vector<128x128xf32>
    %c0_4 = arith.constant 0 : index
    %c0_5 = arith.constant 0 : index
    %6 = vector.load %arg5[%c0_4, %c0_5] : memref<1x128xf32, #tpu.memory_space<vmem>>, vector<1x128xf32>
    %7 = vector.broadcast %6 : vector<1x128xf32> to vector<128x128xf32>
    %8 = arith.addf %5, %7 : vector<128x128xf32>
    %cst_6 = arith.constant 0.000000e+00 : f32
    %9 = vector.broadcast %cst_6 : f32 to vector<128x128xf32>
    %10 = arith.subf %9, %8 : vector<128x128xf32>
    %11 = math.exp %10 : vector<128x128xf32>
    %cst_7 = arith.constant 1.000000e+00 : f32
    %12 = vector.broadcast %cst_7 : f32 to vector<128x128xf32>
    %13 = arith.addf %12, %11 : vector<128x128xf32>
    %14 = tpu.reciprocal %13 {approx = true} : vector<128x128xf32> -> vector<128x128xf32>
    %15 = arith.mulf %8, %14 : vector<128x128xf32>
    %16 = arith.truncf %15 : vector<128x128xf32> to vector<128x128xbf16>
    %c0_8 = arith.constant 0 : index
    %c0_9 = arith.constant 0 : index
    %17 = vector.load %arg6[%c0_8, %c0_9] : memref<128x128xbf16, #tpu.memory_space<vmem>>, vector<128x128xbf16>
    %cst_10 = arith.constant dense<0.000000e+00> : vector<128x128xf32>
    %18 = tpu.matmul %16, %17, %cst_10 {dimension_numbers = #tpu.dot_dimension_numbers<[1], [0], [0], [1], [0, 0, 1, 1], [], []>} : vector<128x128xbf16>, vector<128x128xbf16>, vector<128x128xf32> -> vector<128x128xf32>
    %c0_11 = arith.constant 0 : index
    %c0_12 = arith.constant 0 : index
    %19 = vector.load %arg7[%c0_11, %c0_12] : memref<1x128xf32, #tpu.memory_space<vmem>>, vector<1x128xf32>
    %20 = vector.broadcast %19 : vector<1x128xf32> to vector<128x128xf32>
    %21 = arith.addf %18, %20 : vector<128x128xf32>
    %cst_13 = arith.constant 0.000000e+00 : f32
    %22 = vector.broadcast %cst_13 : f32 to vector<128x128xf32>
    %23 = arith.subf %22, %21 : vector<128x128xf32>
    %24 = math.exp %23 : vector<128x128xf32>
    %cst_14 = arith.constant 1.000000e+00 : f32
    %25 = vector.broadcast %cst_14 : f32 to vector<128x128xf32>
    %26 = arith.addf %25, %24 : vector<128x128xf32>
    %27 = tpu.reciprocal %26 {approx = true} : vector<128x128xf32> -> vector<128x128xf32>
    %28 = arith.mulf %21, %27 : vector<128x128xf32>
    %29 = arith.truncf %28 : vector<128x128xf32> to vector<128x128xbf16>
    %30 = tpu.iota {dimensions = array<i32: 0>} : vector<8x128xi32>
    %c0_15 = arith.constant 0 : index
    %c0_16 = arith.constant 0 : index
    %31 = vector.load %arg3[%c0_15, %c0_16] : memref<1x128xi32, #tpu.memory_space<vmem>>, vector<1x128xi32>
    %32 = vector.broadcast %31 : vector<1x128xi32> to vector<8x128xi32>
    %33 = arith.cmpi eq, %30, %32 : vector<8x128xi32>
    %c0_17 = arith.constant 0 : index
    %c0_18 = arith.constant 0 : index
    %34 = vector.load %arg2[%c0_17, %c0_18] : memref<1x128xf32, #tpu.memory_space<vmem>>, vector<1x128xf32>
    %cst_19 = arith.constant 0.000000e+00 : f32
    %35 = vector.shape_cast %34 : vector<1x128xf32> to vector<1x128xf32>
    %36 = vector.broadcast %35 : vector<1x128xf32> to vector<8x128xf32>
    %37 = vector.broadcast %cst_19 : f32 to vector<8x128xf32>
    %38 = arith.select %33, %36, %37 : vector<8x128xi1>, vector<8x128xf32>
    %39 = arith.truncf %38 : vector<8x128xf32> to vector<8x128xbf16>
    %c0_20 = arith.constant 0 : index
    %c0_21 = arith.constant 0 : index
    %40 = vector.load %arg15[%c0_20, %c0_21] : memref<8x128xf32, #tpu.memory_space<vmem>>, vector<8x128xf32>
    %cst_22 = arith.constant dense<0.000000e+00> : vector<8x128xf32>
    %41 = tpu.matmul %39, %29, %cst_22 {dimension_numbers = #tpu.dot_dimension_numbers<[1], [0], [0], [1], [0, 0, 1, 1], [], []>} : vector<8x128xbf16>, vector<128x128xbf16>, vector<8x128xf32> -> vector<8x128xf32>
    %42 = arith.addf %40, %41 : vector<8x128xf32>
    %c0_23 = arith.constant 0 : index
    %c0_24 = arith.constant 0 : index
    %43 = vector.load %arg15[%c0_23, %c0_24] : memref<8x128xf32, #tpu.memory_space<vmem>>, vector<8x128xf32>
    tpu.vector_store %arg15[%c0_23, %c0_24], %42 {strides = array<i32>} : memref<8x128xf32, #tpu.memory_space<vmem>>, vector<8x128xf32>,
    %c0_i32_25 = arith.constant 0 : i32
    %44 = arith.cmpi eq, %arg0, %c0_i32_25 : i32
    %45 = arith.extui %44 : i1 to i32
    %c0_i32_26 = arith.constant 0 : i32
    %46 = arith.cmpi ne, %45, %c0_i32_26 : i32
    scf.if %46 {
      %c0_27 = arith.constant 0 : index
      %c0_28 = arith.constant 0 : index
      %47 = vector.load %arg8[%c0_27, %c0_28] : memref<8x128xf32, #tpu.memory_space<vmem>>, vector<8x128xf32>
      %48 = arith.truncf %47 : vector<8x128xf32> to vector<8x128xbf16>
      %c0_29 = arith.constant 0 : index
      %c0_30 = arith.constant 0 : index
      %49 = vector.load %arg9[%c0_29, %c0_30] : memref<128x128xbf16, #tpu.memory_space<vmem>>, vector<128x128xbf16>
      %cst_31 = arith.constant dense<0.000000e+00> : vector<8x128xf32>
      %50 = tpu.matmul %48, %49, %cst_31 {dimension_numbers = #tpu.dot_dimension_numbers<[1], [0], [0], [1], [0, 0, 1, 1], [], []>} : vector<8x128xbf16>, vector<128x128xbf16>, vector<8x128xf32> -> vector<8x128xf32>
      %c0_32 = arith.constant 0 : index
      %c0_33 = arith.constant 0 : index
      %51 = vector.load %arg15[%c0_32, %c0_33] : memref<8x128xf32, #tpu.memory_space<vmem>>, vector<8x128xf32>
      %52 = arith.truncf %51 : vector<8x128xf32> to vector<8x128xbf16>
      %c0_34 = arith.constant 0 : index
      %c0_35 = arith.constant 0 : index
      %53 = vector.load %arg10[%c0_34, %c0_35] : memref<128x128xbf16, #tpu.memory_space<vmem>>, vector<128x128xbf16>
      %cst_36 = arith.constant dense<0.000000e+00> : vector<8x128xf32>
      %54 = tpu.matmul %52, %53, %cst_36 {dimension_numbers = #tpu.dot_dimension_numbers<[1], [0], [0], [1], [0, 0, 1, 1], [], []>} : vector<8x128xbf16>, vector<128x128xbf16>, vector<8x128xf32> -> vector<8x128xf32>
      %55 = arith.addf %50, %54 : vector<8x128xf32>
      %c0_37 = arith.constant 0 : index
      %c0_38 = arith.constant 0 : index
      %56 = vector.load %arg11[%c0_37, %c0_38] : memref<1x128xf32, #tpu.memory_space<vmem>>, vector<1x128xf32>
      %57 = vector.broadcast %56 : vector<1x128xf32> to vector<8x128xf32>
      %58 = arith.addf %55, %57 : vector<8x128xf32>
      %cst_39 = arith.constant 0.000000e+00 : f32
      %59 = vector.broadcast %cst_39 : f32 to vector<8x128xf32>
      %60 = arith.subf %59, %58 : vector<8x128xf32>
      %61 = math.exp %60 : vector<8x128xf32>
      %cst_40 = arith.constant 1.000000e+00 : f32
      %62 = vector.broadcast %cst_40 : f32 to vector<8x128xf32>
      %63 = arith.addf %62, %61 : vector<8x128xf32>
      %64 = tpu.reciprocal %63 {approx = true} : vector<8x128xf32> -> vector<8x128xf32>
      %65 = arith.mulf %58, %64 : vector<8x128xf32>
      %66 = arith.truncf %65 : vector<8x128xf32> to vector<8x128xbf16>
      %c0_41 = arith.constant 0 : index
      %c0_42 = arith.constant 0 : index
      %67 = vector.load %arg12[%c0_41, %c0_42] : memref<128x128xbf16, #tpu.memory_space<vmem>>, vector<128x128xbf16>
      %cst_43 = arith.constant dense<0.000000e+00> : vector<8x128xf32>
      %68 = tpu.matmul %66, %67, %cst_43 {dimension_numbers = #tpu.dot_dimension_numbers<[1], [0], [0], [1], [0, 0, 1, 1], [], []>} : vector<8x128xbf16>, vector<128x128xbf16>, vector<8x128xf32> -> vector<8x128xf32>
      %c0_44 = arith.constant 0 : index
      %c0_45 = arith.constant 0 : index
      %69 = vector.load %arg13[%c0_44, %c0_45] : memref<1x128xf32, #tpu.memory_space<vmem>>, vector<1x128xf32>
      %70 = vector.broadcast %69 : vector<1x128xf32> to vector<8x128xf32>
      %71 = arith.addf %68, %70 : vector<8x128xf32>
      %cst_46 = arith.constant 0.000000e+00 : f32
      %72 = vector.broadcast %cst_46 : f32 to vector<8x128xf32>
      %73 = arith.subf %72, %71 : vector<8x128xf32>
      %74 = math.exp %73 : vector<8x128xf32>
      %cst_47 = arith.constant 1.000000e+00 : f32
      %75 = vector.broadcast %cst_47 : f32 to vector<8x128xf32>
      %76 = arith.addf %75, %74 : vector<8x128xf32>
      %77 = tpu.reciprocal %76 {approx = true} : vector<8x128xf32> -> vector<8x128xf32>
      %78 = arith.mulf %71, %77 : vector<8x128xf32>
      %79 = arith.addf %47, %78 : vector<8x128xf32>
      %c0_48 = arith.constant 0 : index
      %c0_49 = arith.constant 0 : index
      %80 = vector.load %arg14[%c0_48, %c0_49] : memref<8x128xf32, #tpu.memory_space<vmem>>, vector<8x128xf32>
      tpu.vector_store %arg14[%c0_48, %c0_49], %79 {strides = array<i32>} : memref<8x128xf32, #tpu.memory_space<vmem>>, vector<8x128xf32>,
    } else {
    }
    return
  }
  func.func @transform_0(%arg0: i32) -> (i32, i32) {
    %c0_i32 = arith.constant 0 : i32
    %c0_i32_0 = arith.constant 0 : i32
    return %arg0, %c0_i32 : i32, i32
  }
  func.func @transform_1(%arg0: i32) -> (i32, i32) {
    %c0_i32 = arith.constant 0 : i32
    %c0_i32_0 = arith.constant 0 : i32
    return %c0_i32, %arg0 : i32, i32
  }
  func.func @transform_2(%arg0: i32) -> (i32, i32) {
    %c0_i32 = arith.constant 0 : i32
    %c0_i32_0 = arith.constant 0 : i32
    return %c0_i32, %arg0 : i32, i32
  }
  func.func @transform_3(%arg0: i32) -> (i32, i32) {
    %c0_i32 = arith.constant 0 : i32
    %c0_i32_0 = arith.constant 0 : i32
    %c0_i32_1 = arith.constant 0 : i32
    return %c0_i32, %c0_i32_0 : i32, i32
  }
  func.func @transform_4(%arg0: i32) -> (i32, i32) {
    %c0_i32 = arith.constant 0 : i32
    %c0_i32_0 = arith.constant 0 : i32
    %c0_i32_1 = arith.constant 0 : i32
    return %c0_i32, %c0_i32_0 : i32, i32
  }
  func.func @transform_5(%arg0: i32) -> (i32, i32) {
    %c0_i32 = arith.constant 0 : i32
    %c0_i32_0 = arith.constant 0 : i32
    %c0_i32_1 = arith.constant 0 : i32
    return %c0_i32, %c0_i32_0 : i32, i32
  }
  func.func @transform_6(%arg0: i32) -> (i32, i32) {
    %c0_i32 = arith.constant 0 : i32
    %c0_i32_0 = arith.constant 0 : i32
    %c0_i32_1 = arith.constant 0 : i32
    return %c0_i32, %c0_i32_0 : i32, i32
  }
  func.func @transform_7(%arg0: i32) -> (i32, i32) {
    %c0_i32 = arith.constant 0 : i32
    %c0_i32_0 = arith.constant 0 : i32
    %c0_i32_1 = arith.constant 0 : i32
    return %c0_i32, %c0_i32_0 : i32, i32
  }
  func.func @transform_8(%arg0: i32) -> (i32, i32) {
    %c0_i32 = arith.constant 0 : i32
    %c0_i32_0 = arith.constant 0 : i32
    %c0_i32_1 = arith.constant 0 : i32
    return %c0_i32, %c0_i32_0 : i32, i32
  }
  func.func @transform_9(%arg0: i32) -> (i32, i32) {
    %c0_i32 = arith.constant 0 : i32
    %c0_i32_0 = arith.constant 0 : i32
    %c0_i32_1 = arith.constant 0 : i32
    return %c0_i32, %c0_i32_0 : i32, i32
  }
  func.func @transform_10(%arg0: i32) -> (i32, i32) {
    %c0_i32 = arith.constant 0 : i32
    %c0_i32_0 = arith.constant 0 : i32
    %c0_i32_1 = arith.constant 0 : i32
    return %c0_i32, %c0_i32_0 : i32, i32
  }
  func.func @transform_11(%arg0: i32) -> (i32, i32) {
    %c0_i32 = arith.constant 0 : i32
    %c0_i32_0 = arith.constant 0 : i32
    %c0_i32_1 = arith.constant 0 : i32
    return %c0_i32, %c0_i32_0 : i32, i32
  }
  func.func @transform_12(%arg0: i32) -> (i32, i32) {
    %c0_i32 = arith.constant 0 : i32
    %c0_i32_0 = arith.constant 0 : i32
    %c0_i32_1 = arith.constant 0 : i32
    return %c0_i32, %c0_i32_0 : i32, i32
  }
  func.func @transform_13(%arg0: i32) -> (i32, i32) {
    %c0_i32 = arith.constant 0 : i32
    %c0_i32_0 = arith.constant 0 : i32
    %c0_i32_1 = arith.constant 0 : i32
    return %c0_i32, %c0_i32_0 : i32, i32
  }
}

</mosaic_0001>

<bundles_post_ra>
// kernel: csp_layer_forward.1
= control target key start
LH: loop header
LB: loop body
LE: loop exit
PB: predicated region body
PF: predicated region fallthrough
CT: control target
= control target key end

     0   :  { %s2564_s0 = inlined_call_operand.vmem [shape: bf16[128,384], index: 0, kind: input, shape index: {}]   ;;  %s2565_s1 = inlined_call_operand.vmem [shape: f32[1,128], index: 1, kind: input, shape index: {}]   ;;  %s2566_s2 = inlined_call_operand.vmem [shape: s32[1,128], index: 2, kind: input, shape index: {}]   ;;  %s2567_s3 = inlined_call_operand.vmem [shape: bf16[384,128], index: 3, kind: input, shape index: {}]   ;;  %s2568_s4 = inlined_call_operand.vmem [shape: f32[1,128], index: 4, kind: input, shape index: {}]   ;;  %s2569_s5 = inlined_call_operand.vmem [shape: bf16[128,128], index: 5, kind: input, shape index: {}]   ;;  %s2570_s6 = inlined_call_operand.vmem [shape: f32[1,128], index: 6, kind: input, shape index: {}]   ;;  %s2571_s7 = inlined_call_operand.vmem [shape: f32[8,128], index: 7, kind: input, shape index: {}]   ;;  %s2572_s8 = inlined_call_operand.vmem [shape: bf16[128,128], index: 8, kind: input, shape index: {}]   ;;  %s2573_s9 = inlined_call_operand.vmem [shape: bf16[128,128], index: 9, kind: input, shape index: {}]   ;;  %s2574_s10 = inlined_call_operand.vmem [shape: f32[1,128], index: 10, kind: input, shape index: {}]   ;;  %s2575_s11 = inlined_call_operand.vmem [shape: bf16[128,128], index: 11, kind: input, shape index: {}]   ;;  %s2576_s12 = inlined_call_operand.vmem [shape: f32[1,128], index: 12, kind: input, shape index: {}]   ;;  %s2577_s13 = inlined_call_operand.hbm [shape: f32[8,128], index: 13, kind: output, shape index: {}]  }
   0x1   :  { %v1771_v0 = vld [vmem:[%s2567_s3 + $0x40] sm:$0xff]   ;;  %v1773_v2 = vld [vmem:[%s2567_s3 + $0x48] sm:$0xff]   ;;  %v1776_v5 = vld [vmem:[%s2567_s3 + $0x50] sm:$0xff]  }
   0x2   :  { %v1772_v1 = vld [vmem:[%s2567_s3] sm:$0xff]   ;;  %1492 = vmatprep.subr.bf16.mxu0 %v1771_v0  ;;  %v1775_v4 = vld [vmem:[%s2567_s3 + $0x8] sm:$0xff]   ;;  %v1778_v7 = vld [vmem:[%s2567_s3 + $0x10] sm:$0xff]  }
   0x3   :  { %1493 = vmatpush3.bf16.msra.mxu0 %v1772_v1  ;;  %v1774_v3 = vld [vmem:[%s2567_s3 + $0x80] sm:$0xff]   ;;  %v1777_v6 = vld [vmem:[%s2567_s3 + $0x88] sm:$0xff]   ;;  %v1779_v8 = vld [vmem:[%s2567_s3 + $0x58] sm:$0xff]  }
   0x4   :  { %1494 = vmatprep.subr.bf16.mxu0 %v1773_v2  ;;  %1624 = vmatprep.subr.bf16.mxu1 %v1774_v3  ;;  %v1780_v9 = vld [vmem:[%s2567_s3 + $0x90] sm:$0xff]   ;;  %v1781_v10 = vld [vmem:[%s2567_s3 + $0x18] sm:$0xff]   ;;  %v1782_v11 = vld [vmem:[%s2567_s3 + $0x60] sm:$0xff]  }
   0x5   :  { %1625 = vmatpush3.bf16.msra.mxu1 %v1774_v3  ;;  %v1783_v12 = vld [vmem:[%s2567_s3 + $0x98] sm:$0xff]   ;;  %v1784_v13 = vld [vmem:[%s2567_s3 + $0x20] sm:$0xff]   ;;  %v1785_v15 = vld [vmem:[%s2567_s3 + $0x68] sm:$0xff]  }
   0x6   :  { %1626 = vmatprep.subr.bf16.mxu1 %v1777_v6  ;;  %v1786_v14 = vld [vmem:[%s2567_s3 + $0xa0] sm:$0xff]   ;;  %v1787_v16 = vld [vmem:[%s2567_s3 + $0x28] sm:$0xff]   ;;  %v1788_v18 = vld [vmem:[%s2567_s3 + $0x70] sm:$0xff]  }
   0x7   :  { %1495 = vmatpush3.bf16.msra.mxu0 %v1775_v4  ;;  %v1789_v17 = vld [vmem:[%s2567_s3 + $0xa8] sm:$0xff]   ;;  %v1790_v19 = vld [vmem:[%s2567_s3 + $0x30] sm:$0xff]   ;;  %v1791_v20 = vld [vmem:[%s2567_s3 + $0x78] sm:$0xff]  }
   0x8   :  { %1496 = vmatprep.subr.bf16.mxu0 %v1776_v5  ;;  %v1792_v21 = vld [vmem:[%s2567_s3 + $0xb0] sm:$0xff]   ;;  %v1793_v23 = vld [vmem:[%s2567_s3 + $0x38] sm:$0xff]   ;;  %v1794_v26 = vld [vmem:[%s2564_s0] ss:$12 sps:$4 sm:$0xff]  }
   0x9   :  { %1627 = vmatpush3.bf16.msra.mxu1 %v1777_v6  ;;  %v1796_v22 = vld [vmem:[%s2564_s0 + $0x4] ss:$12 sps:$4 sm:$0xff]   ;;  %v1798_v24 = vld [vmem:[%s2564_s0 + $0x8] ss:$12 sps:$4 sm:$0xff]   ;;  %v1797_v25 = vld [vmem:[%s2567_s3 + $0xb8] sm:$0xff]  }
   0xa   :  { %1628 = vmatprep.subr.bf16.mxu1 %v1780_v9  ;;  %442 = vmatprep.mubr.bf16.mxu0 %v1796_v22  ;;  %v1800_v27 = vld [vmem:[%s2564_s0 + $0x1c] ss:$12 sps:$4 sm:$0xff]   ;;  %v1799_v28 = vld [vmem:[%s2564_s0 + $0x20] ss:$12 sps:$4 sm:$0xff]   ;;  %v1806_v29 = vld [vmem:[%s2564_s0 + $0x38] ss:$12 sps:$4 sm:$0xff]  }
   0xb   :  { %1497 = vmatpush3.bf16.msra.mxu0 %v1778_v7  ;;  %1640 = vmatprep.mubr.bf16.mxu1 %v1798_v24  ;;  %v1802_v30 = vld [vmem:[%s2564_s0 + $0x18] ss:$12 sps:$4 sm:$0xff]   ;;  %v1803_v31 = vld [vmem:[%s2564_s0 + $0x34] ss:$12 sps:$4 sm:$0xff]   ;;  %v1807_v32 = vld [vmem:[%s2564_s0 + $0x50] ss:$12 sps:$4 sm:$0xff]  }
   0xc   :  { %1498 = vmatprep.subr.bf16.mxu0 %v1779_v8  ;;  %v1814_v33 = vld [vmem:[%s2564_s0 + $0x68] ss:$12 sps:$4 sm:$0xff]   ;;  %v1805_v34 = vld [vmem:[%s2564_s0 + $0x30] ss:$12 sps:$4 sm:$0xff]   ;;  %v1808_v35 = vld [vmem:[%s2564_s0 + $0x4c] ss:$12 sps:$4 sm:$0xff]  }
   0xd   :  { %1629 = vmatpush3.bf16.msra.mxu1 %v1780_v9  ;;  %v1815_v36 = vld [vmem:[%s2564_s0 + $0x80] ss:$12 sps:$4 sm:$0xff]   ;;  %v1822_v37 = vld [vmem:[%s2564_s0 + $0x98] ss:$12 sps:$4 sm:$0xff]   ;;  %v1810_v38 = vld [vmem:[%s2564_s0 + $0x48] ss:$12 sps:$4 sm:$0xff]  }
   0xe   :  { %1630 = vmatprep.subr.bf16.mxu1 %v1783_v12  ;;  %v1811_v39 = vld [vmem:[%s2564_s0 + $0x64] ss:$12 sps:$4 sm:$0xff]   ;;  %v1813_v41 = vld [vmem:[%s2564_s0 + $0x60] ss:$12 sps:$4 sm:$0xff]   ;;  %v1816_v42 = vld [vmem:[%s2564_s0 + $0x7c] ss:$12 sps:$4 sm:$0xff]  }
   0xf   :  { %1499 = vmatpush3.bf16.msra.mxu0 %v1781_v10  ;;  %v1823_v40 = vld [vmem:[%s2564_s0 + $0xb0] ss:$12 sps:$4 sm:$0xff]  }
  0x10   :  { %1500 = vmatprep.subr.bf16.mxu0 %v1782_v11 }
  0x11   :  { %1631 = vmatpush3.bf16.msra.mxu1 %v1783_v12 }
  0x12   :  { %1632 = vmatprep.subr.bf16.mxu1 %v1786_v14 }
  0x13   :  { %1501 = vmatpush3.bf16.msra.mxu0 %v1784_v13 }
  0x14   :  { %1502 = vmatprep.subr.bf16.mxu0 %v1785_v15 }
  0x15   :  { %1633 = vmatpush3.bf16.msra.mxu1 %v1786_v14 }
  0x16   :  { %1634 = vmatprep.subr.bf16.mxu1 %v1789_v17 }
  0x17   :  { %1503 = vmatpush3.bf16.msra.mxu0 %v1787_v16 }
  0x18   :  { %1504 = vmatprep.subr.bf16.mxu0 %v1788_v18 }
  0x19   :  { %1635 = vmatpush3.bf16.msra.mxu1 %v1789_v17 }
  0x1a   :  { %1636 = vmatprep.subr.bf16.mxu1 %v1792_v21 }
  0x1b   :  { %1505 = vmatpush3.bf16.msra.mxu0 %v1790_v19 }
  0x1c   :  { %1506 = vmatprep.subr.bf16.mxu0 %v1791_v20 }
  0x1d   :  { %1637 = vmatpush3.bf16.msra.mxu1 %v1792_v21 }
  0x1e   :  { %1638 = vmatprep.subr.bf16.mxu1 %v1797_v25 }
  0x1f   :  { %1507 = vmatpush3.bf16.msra.mxu0 %v1793_v23 }
  0x21   :  { %1639 = vmatpush3.bf16.msra.mxu1 %v1797_v25 }
  0x22   :  { %443 = vmatmul.mubr.bf16.vlgmr.msra.gmra.mrb[0].mxu0 %v1794_v26 }
  0x23   :  { %450 = vmatprep.mubr.bf16.mxu0 %v1800_v27 }
  0x24   :  { %1641 = vmatmul.mubr.bf16.vlgmr.msra.gmra.mrb[0].mxu1 %v1799_v28 }
  0x25   :  { %1644 = vmatprep.mubr.bf16.mxu1 %v1806_v29 }
  0x2a   :  { %451 = vmatmul.mubr.bf16.gmra.mrb[4].mxu0 %v1802_v30 }
  0x2b   :  { %458 = vmatprep.mubr.bf16.mxu0 %v1803_v31 }
  0x2c   :  { %1645 = vmatmul.mubr.bf16.gmra.mrb[4].mxu1 %v1807_v32 }
  0x2d   :  { %1648 = vmatprep.mubr.bf16.mxu1 %v1814_v33 }
  0x32   :  { %459 = vmatmul.mubr.bf16.gmra.mrb[8].mxu0 %v1805_v34 }
  0x33   :  { %466 = vmatprep.mubr.bf16.mxu0 %v1808_v35 }
  0x34   :  { %1649 = vmatmul.mubr.bf16.gmra.mrb[8].mxu1 %v1815_v36 }
  0x35   :  { %1652 = vmatprep.mubr.bf16.mxu1 %v1822_v37 }
  0x3a   :  { %467 = vmatmul.mubr.bf16.gmra.mrb[12].mxu0 %v1810_v38 }
  0x3b   :  { %474 = vmatprep.mubr.bf16.mxu0 %v1811_v39 }
  0x3c   :  { %1653 = vmatmul.mubr.bf16.gmra.mrb[12].mxu1 %v1823_v40 }
  0x3d   :  { %18 = vsyncpa [#allocation4], 0  ;;  %v1818_v43 = vld [vmem:[%s2564_s0 + $0x78] ss:$12 sps:$4 sm:$0xff]   ;;  %v1819_v44 = vld [vmem:[%s2564_s0 + $0x94] ss:$12 sps:$4 sm:$0xff]  }
  0x3e   :  { %v1821_v45 = vld [vmem:[%s2564_s0 + $0x90] ss:$12 sps:$4 sm:$0xff]   ;;  %v1824_v46 = vld [vmem:[%s2564_s0 + $0xac] ss:$12 sps:$4 sm:$0xff]   ;;  %v1826_v47 = vld [vmem:[%s2564_s0 + $0xa8] ss:$12 sps:$4 sm:$0xff]  }
  0x3f   :  { %v1827_v48 = vld [vmem:[%s2569_s5] sm:$0xff]   ;;  %v1828_v49 = vld [vmem:[%s2569_s5 + $0x8] sm:$0xff]   ;;  %v1829_v50 = vld [vmem:[%s2569_s5 + $0x10] sm:$0xff]   ;;  %vm2020_vm0 = vmmov 0  }
  0x40   :  { %1656 = vmatprep.subr.bf16.mxu1 %v1827_v48  ;;  %v1830_v51 = vld [vmem:[%s2569_s5 + $0x18] sm:$0xff]   ;;  %v1831_v52 = vld [vmem:[%s2569_s5 + $0x20] sm:$0xff]   ;;  %v1832_v53 = vld [vmem:[%s2569_s5 + $0x28] sm:$0xff]  }
  0x41   :  { %1657 = vmatpush3.bf16.msra.mxu1 %v1827_v48  ;;  %v1833_v54 = vld [vmem:[%s2569_s5 + $0x30] sm:$0xff]   ;;  %v1834_v55 = vld [vmem:[%s2569_s5 + $0x38] sm:$0xff]   ;;  %v2263_v58 = vld [vmem:[%s2568_s4] ss:$0 sm:$0xff] }
  0x42   :  { %475 = vmatmul.mubr.bf16.gmra.mrb[16].mxu0 %v1813_v41  ;;  %1658 = vmatprep.subr.bf16.mxu1 %v1828_v49 }
  0x43   :  { %482 = vmatprep.mubr.bf16.mxu0 %v1816_v42 }
  0x45   :  { %1659 = vmatpush3.bf16.msra.mxu1 %v1828_v49 }
  0x46   :  { %1660 = vmatprep.subr.bf16.mxu1 %v1829_v50 }
  0x49   :  { %1661 = vmatpush3.bf16.msra.mxu1 %v1829_v50 }
  0x4a   :  { %483 = vmatmul.mubr.bf16.gmra.mrb[20].mxu0 %v1818_v43  ;;  %1662 = vmatprep.subr.bf16.mxu1 %v1830_v51 }
  0x4b   :  { %490 = vmatprep.mubr.bf16.mxu0 %v1819_v44 }
  0x4d   :  { %1663 = vmatpush3.bf16.msra.mxu1 %v1830_v51 }
  0x4e   :  { %1664 = vmatprep.subr.bf16.mxu1 %v1831_v52 }
  0x51   :  { %1665 = vmatpush3.bf16.msra.mxu1 %v1831_v52 }
  0x52   :  { %491 = vmatmul.mubr.bf16.gmra.mrb[24].mxu0 %v1821_v45  ;;  %1666 = vmatprep.subr.bf16.mxu1 %v1832_v53 }
  0x53   :  { %498 = vmatprep.mubr.bf16.mxu0 %v1824_v46 }
  0x55   :  { %1667 = vmatpush3.bf16.msra.mxu1 %v1832_v53 }
  0x56   :  { %1668 = vmatprep.subr.bf16.mxu1 %v1833_v54 }
  0x59   :  { %1669 = vmatpush3.bf16.msra.mxu1 %v1833_v54 }
  0x5a   :  { %499 = vmatmul.mubr.bf16.gmra.mrb[28].mxu0 %v1826_v47  ;;  %1670 = vmatprep.subr.bf16.mxu1 %v1834_v55 }
  0x5d   :  { %1671 = vmatpush3.bf16.msra.mxu1 %v1834_v55 }
  0xf5   :  { %v1508_v56 = vpop.f32.mrb[0].mxu0 }
  0xf6   :  { %v1509_v57 = vpop.f32.mrb[1].mxu0 }
  0xf7   :  { %v1510_v59 = vadd.f32 %v1509_v57, %v1508_v56  ;;  %v1511_v60 = vpop.f32.mrb[2].mxu0  ;;  %v1642_v62 = vpop.f32.mrb[0].mxu1 }
  0xf8   :  { %v1512_v61 = vpop.f32.mrb[3].mxu0  ;;  %v541_v1 = vpop.f32.mrb[1].mxu1 }
  0xf9   :  { %v1513_v63 = vadd.f32 %v1512_v61, %v1511_v60  ;;  %v445_v0 = vadd.f32 %v1510_v59, %v2263_v58  ;;  %v1643_v2 = vpop.f32.mrb[2].mxu1 }
  0xfa   :  { %v544_v5 = vpop.f32.mrb[3].mxu1 }
  0xfb   :  { %v2266_v3 = vadd.f32 %v541_v1, %v445_v0  ;;  %v448_v4 = vadd.f32 %v1513_v63, %v2263_v58 }
  0xfd   :  { %v604_v6 = vsub.f32 0.0, %v2266_v3  ;;  %v2270_v7 = vadd.f32 %v544_v5, %v448_v4  ;;  %v1514_v8 = vpop.f32.mrb[4].mxu0 }
  0xfe   :  { %v1515_v9 = vpop.f32.mrb[5].mxu0 }
  0xff   :  { %v620_v10 = vmul.f32 1.442695, %v604_v6  ;;  %v605_v11 = vsub.f32 0.0, %v2270_v7  ;;  %v1516_v12 = vadd.f32 %v1515_v9, %v1514_v8  ;;  %v1517_v13 = vpop.f32.mrb[6].mxu0  ;;  %v1646_v15 = vpop.f32.mrb[4].mxu1 }
 0x100   :  { %v1518_v14 = vpop.f32.mrb[7].mxu0  ;;  %v557_v19 = vpop.f32.mrb[5].mxu1 }
 0x101   :  { %1859 = vpow2.f32 %v620_v10  ;;  %v622_v16 = vmul.f32 1.442695, %v605_v11  ;;  %v453_v17 = vadd.f32 %v1516_v12, %v2263_v58  ;;  %v1519_v18 = vadd.f32 %v1518_v14, %v1517_v13  ;;  %v1647_v20 = vpop.f32.mrb[6].mxu1 }
 0x102   :  { %v560_v23 = vpop.f32.mrb[7].mxu1 }
 0x103   :  { %1861 = vpow2.f32 %v622_v16  ;;  %v2274_v21 = vadd.f32 %v1642_v62, %v453_v17  ;;  %v456_v22 = vadd.f32 %v1519_v18, %v2263_v58 }
 0x105   :  { %v606_v24 = vsub.f32 0.0, %v2274_v21  ;;  %v2278_v25 = vadd.f32 %v1643_v2, %v456_v22  ;;  %v1520_v26 = vpop.f32.mrb[8].mxu0 }
 0x106   :  { %v1521_v27 = vpop.f32.mrb[9].mxu0 }
 0x107   :  { %v624_v28 = vmul.f32 1.442695, %v606_v24  ;;  %v607_v29 = vsub.f32 0.0, %v2278_v25  ;;  %v1522_v30 = vadd.f32 %v1521_v27, %v1520_v26  ;;  %v1523_v31 = vpop.f32.mrb[10].mxu0  ;;  %v2281_v33 = vpop.f32.mrb[8].mxu1 }
 0x108   :  { %v1524_v32 = vpop.f32.mrb[11].mxu0  ;;  %v573_v37 = vpop.f32.mrb[9].mxu1 }
 0x109   :  { %1863 = vpow2.f32 %v624_v28  ;;  %v626_v34 = vmul.f32 1.442695, %v607_v29  ;;  %v1525_v35 = vadd.f32 %v1524_v32, %v1523_v31  ;;  %v461_v36 = vadd.f32 %v1522_v30, %v2263_v58  ;;  %v2284_v38 = vpop.f32.mrb[10].mxu1 }
 0x10a   :  { %v576_v42 = vpop.f32.mrb[11].mxu1 }
 0x10b   :  { %v1860_v39 = vpop.eup %1859  ;;  %1865 = vpow2.f32 %v626_v34  ;;  %v2286_v40 = vadd.f32 %v557_v19, %v461_v36  ;;  %v464_v41 = vadd.f32 %v1525_v35, %v2263_v58 }
 0x10c   :  { %v652_v43 = vadd.f32 1.0, %v1860_v39 }
 0x10d   :  { %v1862_v44 = vpop.eup %1861  ;;  %v608_v45 = vsub.f32 0.0, %v2286_v40  ;;  %v2290_v46 = vadd.f32 %v560_v23, %v464_v41  ;;  %v1526_v47 = vpop.f32.mrb[12].mxu0 }
 0x10e   :  { %1867 = vrcp.f32 %v652_v43  ;;  %v653_v48 = vadd.f32 1.0, %v1862_v44  ;;  %v1527_v49 = vpop.f32.mrb[13].mxu0 }
 0x10f   :  { %v628_v50 = vmul.f32 1.442695, %v608_v45  ;;  %v609_v51 = vsub.f32 0.0, %v2290_v46  ;;  %v1528_v52 = vadd.f32 %v1527_v49, %v1526_v47  ;;  %v1529_v53 = vpop.f32.mrb[14].mxu0  ;;  %v2293_v55 = vpop.f32.mrb[12].mxu1 }
 0x110   :  { %1869 = vrcp.f32 %v653_v48  ;;  %v1530_v54 = vpop.f32.mrb[15].mxu0  ;;  %v2296_v60 = vpop.f32.mrb[13].mxu1 }
 0x111   :  { %1871 = vpow2.f32 %v628_v50  ;;  %v630_v56 = vmul.f32 1.442695, %v609_v51  ;;  %v469_v57 = vadd.f32 %v1528_v52, %v2263_v58  ;;  %v1531_v59 = vadd.f32 %v1530_v54, %v1529_v53  ;;  %v2298_v61 = vpop.f32.mrb[14].mxu1 }
 0x112   :  { %v2303_v1 = vpop.f32.mrb[15].mxu1 }
 0x113   :  { %v1864_v62 = vpop.eup %1863  ;;  %1873 = vpow2.f32 %v630_v56  ;;  %v2300_v63 = vadd.f32 %v1646_v15, %v469_v57  ;;  %v472_v0 = vadd.f32 %v1531_v59, %v2263_v58 }
 0x114   :  { %v654_v2 = vadd.f32 1.0, %v1864_v62 }
 0x115   :  { %v1866_v4 = vpop.eup %1865  ;;  %v610_v5 = vsub.f32 0.0, %v2300_v63  ;;  %v2306_v6 = vadd.f32 %v1647_v20, %v472_v0  ;;  %v1532_v8 = vpop.f32.mrb[16].mxu0 }
 0x116   :  { %1875 = vrcp.f32 %v654_v2  ;;  %v655_v9 = vadd.f32 1.0, %v1866_v4  ;;  %v1533_v10 = vpop.f32.mrb[17].mxu0 }
 0x117   :  { %v632_v11 = vmul.f32 1.442695, %v610_v5  ;;  %v611_v12 = vsub.f32 0.0, %v2306_v6  ;;  %v1534_v13 = vadd.f32 %v1533_v10, %v1532_v8  ;;  %v1535_v14 = vpop.f32.mrb[18].mxu0 }
 0x118   :  { %v1868_v15 = vpop.eup %1867  ;;  %1877 = vrcp.f32 %v655_v9  ;;  %v1536_v16 = vpop.f32.mrb[19].mxu0 }
 0x119   :  { %1879 = vpow2.f32 %v632_v11  ;;  %v634_v17 = vmul.f32 1.442695, %v611_v12  ;;  %v1537_v18 = vadd.f32 %v1536_v16, %v1535_v14  ;;  %v477_v22 = vadd.f32 %v1534_v13, %v2263_v58 }
 0x11a   :  { %v1870_v19 = vpop.eup %1869  ;;  %v684_v23 = vmul.f32 %v1868_v15, %v2266_v3 }
 0x11b   :  { %v1872_v20 = vpop.eup %1871  ;;  %v685_v24 = vmul.f32 %v1870_v19, %v2270_v7  ;;  %1881 = vpow2.f32 %v634_v17  ;;  %v480_v26 = vadd.f32 %v1537_v18, %v2263_v58  ;;  %v2313_v28 = vadd.f32 %v573_v37, %v477_v22 }
 0x11c   :  { %v656_v27 = vadd.f32 1.0, %v1872_v20 }
 0x11d   :  { %v1874_v29 = vpop.eup %1873  ;;  %v2315_v30 = vadd.f32 %v576_v42, %v480_v26  ;;  %v1538_v31 = vpop.f32.mrb[20].mxu0  ;;  %v700_v32 = vpack.c.bf16 %v685_v24, %v684_v23  ;;  %v612_v35 = vsub.f32 0.0, %v2313_v28 }
 0x11e   :  { %1883 = vrcp.f32 %v656_v27  ;;  %v657_v34 = vadd.f32 1.0, %v1874_v29  ;;  %v1539_v36 = vpop.f32.mrb[21].mxu0 }
 0x11f   :  { %v613_v3 = vsub.f32 0.0, %v2315_v30  ;;  %v1540_v39 = vadd.f32 %v1539_v36, %v1538_v31  ;;  %v1541_v7 = vpop.f32.mrb[22].mxu0  ;;  %1672 = vmatprep.mubr.bf16.mxu1 %v700_v32  ;;  %v636_v43 = vmul.f32 1.442695, %v612_v35 }
 0x120   :  { %v1876_v41 = vpop.eup %1875  ;;  %1885 = vrcp.f32 %v657_v34  ;;  %v1542_v37 = vpop.f32.mrb[23].mxu0 }
 0x121   :  { %v638_v44 = vmul.f32 1.442695, %v613_v3  ;;  %v485_v42 = vadd.f32 %v1540_v39, %v2263_v58  ;;  %v1543_v45 = vadd.f32 %v1542_v37, %v1541_v7  ;;  %v686_v48 = vmul.f32 %v1876_v41, %v2274_v21 }
 0x122   :  { %v1878_v47 = vpop.eup %1877  ;;  %1887 = vpow2.f32 %v636_v43 }
 0x123   :  { %v1880_v49 = vpop.eup %1879  ;;  %v687_v50 = vmul.f32 %v1878_v47, %v2278_v25  ;;  %1889 = vpow2.f32 %v638_v44  ;;  %v2323_v51 = vadd.f32 %v2281_v33, %v485_v42  ;;  %v488_v52 = vadd.f32 %v1543_v45, %v2263_v58 }
 0x124   :  { %v658_v53 = vadd.f32 1.0, %v1880_v49 }
 0x125   :  { %v1882_v54 = vpop.eup %1881  ;;  %v701_v56 = vpack.c.bf16 %v687_v50, %v686_v48  ;;  %v614_v57 = vsub.f32 0.0, %v2323_v51  ;;  %v2328_v59 = vadd.f32 %v2284_v38, %v488_v52  ;;  %v1544_v62 = vpop.f32.mrb[24].mxu0 }
 0x126   :  { %1891 = vrcp.f32 %v658_v53  ;;  %v659_v21 = vadd.f32 1.0, %v1882_v54  ;;  %v1545_v0 = vpop.f32.mrb[25].mxu0 }
 0x127   :  { %v640_v2 = vmul.f32 1.442695, %v614_v57  ;;  %v615_v25 = vsub.f32 0.0, %v2328_v59  ;;  %v1546_v4 = vadd.f32 %v1545_v0, %v1544_v62  ;;  %v1547_v33 = vpop.f32.mrb[26].mxu0  ;;  %1673 = vmatmul.mubr.bf16.vlgmr.msra.gmra.mrb[16].mxu1 %v701_v56 }
 0x128   :  { %v1884_v5 = vpop.eup %1883  ;;  %1893 = vrcp.f32 %v659_v21  ;;  %v1548_v8 = vpop.f32.mrb[27].mxu0 }
 0x129   :  { %1895 = vpow2.f32 %v640_v2  ;;  %v642_v9 = vmul.f32 1.442695, %v615_v25  ;;  %v1549_v10 = vadd.f32 %v1548_v8, %v1547_v33  ;;  %v493_v38 = vadd.f32 %v1546_v4, %v2263_v58 }
 0x12a   :  { %v1886_v11 = vpop.eup %1885  ;;  %v688_v12 = vmul.f32 %v1884_v5, %v2286_v40 }
 0x12b   :  { %v689_v13 = vmul.f32 %v1886_v11, %v2290_v46  ;;  %1897 = vpow2.f32 %v642_v9  ;;  %v496_v14 = vadd.f32 %v1549_v10, %v2263_v58  ;;  %v2336_v16 = vadd.f32 %v2296_v60, %v493_v38 }
 0x12c   :  { %v1888_v15 = vpop.eup %1887 }
 0x12d   :  { %v1890_v17 = vpop.eup %1889  ;;  %v660_v18 = vadd.f32 1.0, %v1888_v15  ;;  %v2339_v19 = vadd.f32 %v2303_v1, %v496_v14  ;;  %v1550_v22 = vpop.f32.mrb[28].mxu0  ;;  %v702_v20 = vpack.c.bf16 %v689_v13, %v688_v12  ;;  %v616_v24 = vsub.f32 0.0, %v2336_v16  ;;  %v1835_v14 = vld [vmem:[%s2573_s9] sm:$0xff]   ;;  %v1837_v15 = vld [vmem:[%s2573_s9 + $0x8] sm:$0xff]  }
 0x12e   :  { %v661_v23 = vadd.f32 1.0, %v1890_v17  ;;  %v1551_v40 = vpop.f32.mrb[29].mxu0  ;;  %v2019_v13 = vmov 0.0   ;;  %v1841_v17 = vld [vmem:[%s2573_s9 + $0x18] sm:$0xff]  }
 0x12f   :  { %1899 = vrcp.f32 %v660_v18  ;;  %v617_v46 = vsub.f32 0.0, %v2339_v19  ;;  %v1552_v26 = vadd.f32 %v1551_v40, %v1550_v22  ;;  %v1553_v27 = vpop.f32.mrb[30].mxu0  ;;  %1676 = vmatprep.mubr.bf16.mxu1 %v702_v20  ;;  %v644_v60 = vmul.f32 1.442695, %v616_v24  ;;  %1688 = vmatprep.subr.bf16.mxu0 %v2019_v13  ;;  %v1843_v18 = vld [vmem:[%s2573_s9 + $0x20] sm:$0xff]   ;;  %v1847_v22 = vld [vmem:[%s2573_s9 + $0x30] sm:$0xff]  }
 0x130   :  { %v1892_v29 = vpop.eup %1891  ;;  %1901 = vrcp.f32 %v661_v23  ;;  %v1554_v31 = vpop.f32.mrb[31].mxu0  ;;  %1708 = vmatprep.subr.bf16.mxu1 %v2019_v13  ;;  %1704 = vmatprep.mubr.msk.bf16.mxu0 %vm2020_vm0, %v2019_v13  ;;  %v2392_v20 = vld [vmem:[%s2570_s6] ss:$0 sm:$0xff] }
 0x131   :  { %v646_v32 = vmul.f32 1.442695, %v617_v46  ;;  %v501_v1 = vadd.f32 %v1552_v26, %v2263_v58  ;;  %v1555_v34 = vadd.f32 %v1554_v31, %v1553_v27  ;;  %1903 = vpow2.f32 %v644_v60  ;;  %1709 = vmatpush3.bf16.msra.mxu1 %v1835_v14 }
 0x132   :  { %v1894_v35 = vpop.eup %1893  ;;  %v690_v36 = vmul.f32 %v1892_v29, %v2300_v63  ;;  %1710 = vmatprep.subr.bf16.mxu1 %v2019_v13 }
 0x133   :  { %v1896_v3 = vpop.eup %1895  ;;  %1905 = vpow2.f32 %v646_v32  ;;  %v598_v39 = vadd.f32 %v2293_v55, %v501_v1  ;;  %v504_v7 = vadd.f32 %v1555_v34, %v2263_v58  ;;  %v691_v41 = vmul.f32 %v1894_v35, %v2306_v6 }
 0x134   :  { %v662_v43 = vadd.f32 1.0, %v1896_v3 }
 0x135   :  { %v1898_v37 = vpop.eup %1897  ;;  %v618_v44 = vsub.f32 0.0, %v598_v39  ;;  %v601_v42 = vadd.f32 %v2298_v61, %v504_v7  ;;  %v703_v45 = vpack.c.bf16 %v691_v41, %v690_v36  ;;  %1711 = vmatpush3.bf16.msra.mxu1 %v1837_v15 }
 0x136   :  { %1907 = vrcp.f32 %v662_v43  ;;  %v663_v47 = vadd.f32 1.0, %v1898_v37  ;;  %1712 = vmatprep.subr.bf16.mxu1 %v2019_v13 }
 0x137   :  { %v648_v48 = vmul.f32 1.442695, %v618_v44  ;;  %v619_v49 = vsub.f32 0.0, %v601_v42  ;;  %1677 = vmatmul.mubr.bf16.gmra.mrb[20].mxu1 %v703_v45 }
 0x138   :  { %1909 = vrcp.f32 %v663_v47 }
 0x139   :  { %v1900_v63 = vpop.eup %1899  ;;  %1911 = vpow2.f32 %v648_v48  ;;  %v650_v50 = vmul.f32 1.442695, %v619_v49 }
 0x13a   :  { %v1902_v55 = vpop.eup %1901  ;;  %v692_v58 = vmul.f32 %v1900_v63, %v2313_v28 }
 0x13b   :  { %v693_v6 = vmul.f32 %v1902_v55, %v2315_v30  ;;  %1913 = vpow2.f32 %v650_v50  ;;  %v1904_v52 = vpop.eup %1903 }
 0x13c   :  { %v664_v54 = vadd.f32 1.0, %v1904_v52 }
 0x13d   :  { %v1906_v53 = vpop.eup %1905  ;;  %v704_v61 = vpack.c.bf16 %v693_v6, %v692_v58 }
 0x13e   :  { %v665_v56 = vadd.f32 1.0, %v1906_v53  ;;  %1915 = vrcp.f32 %v664_v54 }
 0x13f   :  { %1680 = vmatprep.mubr.bf16.mxu1 %v704_v61 }
 0x140   :  { %v1908_v57 = vpop.eup %1907  ;;  %1917 = vrcp.f32 %v665_v56 }
 0x141   :  { %v694_v0 = vmul.f32 %v1908_v57, %v2323_v51 }
 0x142   :  { %v1910_v62 = vpop.eup %1909 }
 0x143   :  { %v1912_v21 = vpop.eup %1911  ;;  %v695_v2 = vmul.f32 %v1910_v62, %v2328_v59 }
 0x144   :  { %v666_v25 = vadd.f32 1.0, %v1912_v21 }
 0x145   :  { %v1914_v28 = vpop.eup %1913  ;;  %v705_v4 = vpack.c.bf16 %v695_v2, %v694_v0 }
 0x146   :  { %1919 = vrcp.f32 %v666_v25  ;;  %v667_v30 = vadd.f32 1.0, %v1914_v28 }
 0x147   :  { %1681 = vmatmul.mubr.bf16.gmra.mrb[24].mxu1 %v705_v4 }
 0x148   :  { %1921 = vrcp.f32 %v667_v30  ;;  %v1916_v33 = vpop.eup %1915 }
 0x149   :  { %v696_v8 = vmul.f32 %v1916_v33, %v2336_v16  ;;  %v1839_v16 = vld [vmem:[%s2573_s9 + $0x10] sm:$0xff]  }
 0x14a   :  { %v1918_v5 = vpop.eup %1917  ;;  %1713 = vmatpush3.bf16.msra.mxu1 %v1839_v16 }
 0x14b   :  { %v697_v9 = vmul.f32 %v1918_v5, %v2339_v19  ;;  %1714 = vmatprep.subr.bf16.mxu1 %v2019_v13  ;;  %v1845_v19 = vld [vmem:[%s2573_s9 + $0x28] sm:$0xff]  }
 0x14d   :  { %v706_v10 = vpack.c.bf16 %v697_v9, %v696_v8 }
 0x14e   :  { %1715 = vmatpush3.bf16.msra.mxu1 %v1841_v17 }
 0x14f   :  { %1684 = vmatprep.mubr.bf16.mxu1 %v706_v10  ;;  %1716 = vmatprep.subr.bf16.mxu1 %v2019_v13 }
 0x150   :  { %v1920_v11 = vpop.eup %1919 }
 0x151   :  { %v698_v51 = vmul.f32 %v1920_v11, %v598_v39 }
 0x152   :  { %v1922_v38 = vpop.eup %1921  ;;  %1717 = vmatpush3.bf16.msra.mxu1 %v1843_v18 }
 0x153   :  { %v699_v12 = vmul.f32 %v1922_v38, %v601_v42  ;;  %1718 = vmatprep.subr.bf16.mxu1 %v2019_v13 }
 0x155   :  { %v707_v59 = vpack.c.bf16 %v699_v12, %v698_v51 }
 0x156   :  { %1719 = vmatpush3.bf16.msra.mxu1 %v1845_v19 }
 0x157   :  { %1685 = vmatmul.mubr.bf16.gmra.mrb[28].mxu1 %v707_v59  ;;  %1720 = vmatprep.subr.bf16.mxu1 %v2019_v13 }
 0x158   :  { %1724 = vmatprep.mubr.msk.bf16.mxu1 %vm2020_vm0, %v2019_v13 }
 0x15a   :  { %1721 = vmatpush3.bf16.msra.mxu1 %v1847_v22 }
 0x15b   :  { %1722 = vmatprep.subr.bf16.mxu1 %v2019_v13 }
 0x1fa   :  { %v1674_v23 = vpop.f32.mrb[16].mxu1 }
 0x1fb   :  { %v822_v24 = vadd.f32 %v1674_v23, %v2392_v20  ;;  %v813_v40 = vpop.f32.mrb[17].mxu1 }
 0x1fc   :  { %v814_v46 = vadd.f32 %v2392_v20, %v813_v40  ;;  %v1675_v26 = vpop.f32.mrb[18].mxu1 }
 0x1fd   :  { %v878_v27 = vsub.f32 0.0, %v822_v24  ;;  %v825_v29 = vadd.f32 %v1675_v26, %v2392_v20  ;;  %v816_v60 = vpop.f32.mrb[19].mxu1 }
 0x1fe   :  { %v876_v31 = vsub.f32 0.0, %v814_v46  ;;  %v817_v32 = vadd.f32 %v2392_v20, %v816_v60 }
 0x1ff   :  { %v896_v1 = vmul.f32 1.442695, %v878_v27  ;;  %v879_v34 = vsub.f32 0.0, %v825_v29 }
 0x200   :  { %v892_v35 = vmul.f32 1.442695, %v876_v31  ;;  %v877_v36 = vsub.f32 0.0, %v817_v32 }
 0x201   :  { %1923 = vpow2.f32 %v896_v1  ;;  %v898_v3 = vmul.f32 1.442695, %v879_v34 }
 0x202   :  { %1925 = vpow2.f32 %v892_v35  ;;  %v894_v39 = vmul.f32 1.442695, %v877_v36 }
 0x203   :  { %1927 = vpow2.f32 %v898_v3 }
 0x204   :  { %1929 = vpow2.f32 %v894_v39 }
 0x20a   :  { %v1678_v7 = vpop.f32.mrb[20].mxu1 }
 0x20b   :  { %v1924_v41 = vpop.eup %1923  ;;  %v2399_v43 = vadd.f32 %v1678_v7, %v2392_v20  ;;  %v829_v37 = vpop.f32.mrb[21].mxu1 }
 0x20c   :  { %v1926_v44 = vpop.eup %1925  ;;  %v926_v42 = vadd.f32 1.0, %v1924_v41  ;;  %v2402_v45 = vadd.f32 %v2392_v20, %v829_v37  ;;  %v1679_v47 = vpop.f32.mrb[22].mxu1 }
 0x20d   :  { %v1928_v48 = vpop.eup %1927  ;;  %v924_v49 = vadd.f32 1.0, %v1926_v44  ;;  %v882_v63 = vsub.f32 0.0, %v2399_v43  ;;  %v2406_v50 = vadd.f32 %v1679_v47, %v2392_v20  ;;  %v832_v55 = vpop.f32.mrb[23].mxu1 }
 0x20e   :  { %v1930_v58 = vpop.eup %1929  ;;  %1931 = vrcp.f32 %v926_v42  ;;  %v927_v6 = vadd.f32 1.0, %v1928_v48  ;;  %v880_v52 = vsub.f32 0.0, %v2402_v45  ;;  %v2410_v53 = vadd.f32 %v2392_v20, %v832_v55 }
 0x20f   :  { %1933 = vrcp.f32 %v924_v49  ;;  %v925_v54 = vadd.f32 1.0, %v1930_v58  ;;  %v904_v61 = vmul.f32 1.442695, %v882_v63  ;;  %v883_v56 = vsub.f32 0.0, %v2406_v50 }
 0x210   :  { %1935 = vrcp.f32 %v927_v6  ;;  %v900_v57 = vmul.f32 1.442695, %v880_v52  ;;  %v881_v62 = vsub.f32 0.0, %v2410_v53 }
 0x211   :  { %1937 = vrcp.f32 %v925_v54  ;;  %v906_v21 = vmul.f32 1.442695, %v883_v56 }
 0x212   :  { %1939 = vpow2.f32 %v904_v61  ;;  %v902_v0 = vmul.f32 1.442695, %v881_v62 }
 0x213   :  { %1941 = vpow2.f32 %v900_v57 }
 0x214   :  { %1943 = vpow2.f32 %v906_v21 }
 0x215   :  { %1945 = vpow2.f32 %v902_v0 }
 0x218   :  { %v1932_v2 = vpop.eup %1931 }
 0x219   :  { %v1934_v25 = vpop.eup %1933  ;;  %v958_v33 = vmul.f32 %v1932_v2, %v822_v24 }
 0x21a   :  { %v1936_v28 = vpop.eup %1935  ;;  %v1682_v4 = vpop.f32.mrb[24].mxu1  ;;  %v956_v11 = vmul.f32 %v1934_v25, %v814_v46 }
 0x21b   :  { %v1938_v30 = vpop.eup %1937  ;;  %v959_v5 = vmul.f32 %v1936_v28, %v825_v29  ;;  %v2415_v8 = vadd.f32 %v1682_v4, %v2392_v20  ;;  %v845_v9 = vpop.f32.mrb[25].mxu1 }
 0x21c   :  { %v1940_v10 = vpop.eup %1939  ;;  %v957_v38 = vmul.f32 %v1938_v30, %v817_v32  ;;  %v2418_v51 = vadd.f32 %v2392_v20, %v845_v9  ;;  %v1683_v12 = vpop.f32.mrb[26].mxu1 }
 0x21d   :  { %v1942_v59 = vpop.eup %1941  ;;  %v973_v14 = vpack.c.bf16 %v959_v5, %v958_v33  ;;  %v930_v15 = vadd.f32 1.0, %v1940_v10  ;;  %v886_v16 = vsub.f32 0.0, %v2415_v8  ;;  %v2422_v17 = vadd.f32 %v1683_v12, %v2392_v20  ;;  %v848_v18 = vpop.f32.mrb[27].mxu1 }
 0x21e   :  { %v1944_v19 = vpop.eup %1943  ;;  %v972_v22 = vpack.c.bf16 %v957_v38, %v956_v11  ;;  %v928_v23 = vadd.f32 1.0, %v1942_v59  ;;  %v884_v24 = vsub.f32 0.0, %v2418_v51  ;;  %v2426_v40 = vadd.f32 %v2392_v20, %v848_v18 }
 0x21f   :  { %v1946_v46 = vpop.eup %1945  ;;  %1947 = vrcp.f32 %v930_v15  ;;  %v931_v26 = vadd.f32 1.0, %v1944_v19  ;;  %v912_v27 = vmul.f32 1.442695, %v886_v16  ;;  %v887_v29 = vsub.f32 0.0, %v2422_v17 }
 0x220   :  { %1949 = vrcp.f32 %v928_v23  ;;  %v929_v60 = vadd.f32 1.0, %v1946_v46  ;;  %v908_v31 = vmul.f32 1.442695, %v884_v24  ;;  %v885_v32 = vsub.f32 0.0, %v2426_v40  ;;  %1689 = vmatpush3.bf16.msra.mxu0 %v972_v22 }
 0x221   :  { %1951 = vrcp.f32 %v931_v26  ;;  %v914_v1 = vmul.f32 1.442695, %v887_v29  ;;  %1690 = vmatprep.subr.bf16.mxu0 %v2019_v13 }
 0x222   :  { %1953 = vrcp.f32 %v929_v60  ;;  %v910_v34 = vmul.f32 1.442695, %v885_v32 }
 0x223   :  { %1955 = vpow2.f32 %v912_v27 }
 0x224   :  { %1957 = vpow2.f32 %v908_v31  ;;  %1691 = vmatpush3.bf16.msra.mxu0 %v973_v14 }
 0x225   :  { %1959 = vpow2.f32 %v914_v1  ;;  %1692 = vmatprep.subr.bf16.mxu0 %v2019_v13 }
 0x226   :  { %1961 = vpow2.f32 %v910_v34 }
 0x229   :  { %v1948_v35 = vpop.eup %1947 }
 0x22a   :  { %v1950_v36 = vpop.eup %1949  ;;  %v1686_v3 = vpop.f32.mrb[28].mxu1  ;;  %v962_v44 = vmul.f32 %v1948_v35, %v2399_v43 }
 0x22b   :  { %v1952_v39 = vpop.eup %1951  ;;  %v2433_v7 = vadd.f32 %v1686_v3, %v2392_v20  ;;  %v861_v41 = vpop.f32.mrb[29].mxu1  ;;  %v960_v63 = vmul.f32 %v1950_v36, %v2402_v45  ;;  %v1461_v36 = vld [vmem:[%s2566_s2] ss:$0 sm:$0xff] }
 0x22c   :  { %v1954_v37 = vpop.eup %1953  ;;  %v963_v42 = vmul.f32 %v1952_v39, %v2406_v50  ;;  %v2438_v47 = vadd.f32 %v2392_v20, %v861_v41  ;;  %v1687_v48 = vpop.f32.mrb[30].mxu1  ;;  %v1462_v3 = vld [vmem:[%s2565_s1] ss:$0 sm:$0xff]  ;;  %v1838_v41 = vld [vmem:[%s2572_s8 + $0x8] sm:$0xff]  }
 0x22d   :  { %v1956_v49 = vpop.eup %1955  ;;  %v961_v55 = vmul.f32 %v1954_v37, %v2410_v53  ;;  %v890_v58 = vsub.f32 0.0, %v2433_v7  ;;  %v2444_v6 = vadd.f32 %v1687_v48, %v2392_v20  ;;  %v864_v52 = vpop.f32.mrb[31].mxu1  ;;  %v1464_v39 = vpack.c.bf16 %v1462_v3, %v1462_v3  ;;  %v1840_v37 = vld [vmem:[%s2572_s8 + $0x10] sm:$0xff]  }
 0x22e   :  { %v1958_v54 = vpop.eup %1957  ;;  %v975_v61 = vpack.c.bf16 %v963_v42, %v962_v44  ;;  %v934_v43 = vadd.f32 1.0, %v1956_v49  ;;  %v888_v50 = vsub.f32 0.0, %v2438_v47  ;;  %v865_v56 = vadd.f32 %v2392_v20, %v864_v52  ;;  %v1842_v44 = vld [vmem:[%s2572_s8 + $0x18] sm:$0xff]   ;;  %v1844_v42 = vld [vmem:[%s2572_s8 + $0x20] sm:$0xff]   ;;  %v1848_v48 = vld [vmem:[%s2572_s8 + $0x30] sm:$0xff]  }
 0x22f   :  { %v1960_v57 = vpop.eup %1959  ;;  %v974_v62 = vpack.c.bf16 %v961_v55, %v960_v63  ;;  %v932_v21 = vadd.f32 1.0, %v1958_v54  ;;  %v891_v45 = vsub.f32 0.0, %v2444_v6  ;;  %v920_v2 = vmul.f32 1.442695, %v890_v58  ;;  %v1850_v49 = vld [vmem:[%s2572_s8 + $0x38] sm:$0xff]   ;;  %v2504_v63 = vld [vmem:[%s2571_s7] sm:$0xff] }
 0x230   :  { %v1962_v0 = vpop.eup %1961  ;;  %1963 = vrcp.f32 %v934_v43  ;;  %v935_v53 = vadd.f32 1.0, %v1960_v57  ;;  %v889_v25 = vsub.f32 0.0, %v865_v56  ;;  %v916_v4 = vmul.f32 1.442695, %v888_v50  ;;  %v1849_v55 = vld [vmem:[%s2573_s9 + $0x38] sm:$0xff]  }
 0x231   :  { %1965 = vrcp.f32 %v932_v21  ;;  %v933_v28 = vadd.f32 1.0, %v1962_v0  ;;  %1693 = vmatpush3.bf16.msra.mxu0 %v974_v62  ;;  %v922_v30 = vmul.f32 1.442695, %v891_v45  ;;  %v1044_v58 = vpack.c.bf16 %v2504_v63, %v2504_v63  ;;  %1723 = vmatpush3.bf16.msra.mxu1 %v1849_v55  ;;  %v1851_v21 = vld [vmem:[%s2575_s11] sm:$0xff]   ;;  %v1852_v45 = vld [vmem:[%s2575_s11 + $0x8] sm:$0xff]   ;;  %v1853_v0 = vld [vmem:[%s2575_s11 + $0x10] sm:$0xff]  }
 0x232   :  { %1967 = vrcp.f32 %v935_v53  ;;  %1694 = vmatprep.subr.bf16.mxu0 %v2019_v13  ;;  %v918_v20 = vmul.f32 1.442695, %v889_v25  ;;  %1748 = vmatprep.subr.bf16.mxu1 %v2019_v13  ;;  %v1854_v53 = vld [vmem:[%s2575_s11 + $0x18] sm:$0xff]   ;;  %v1856_v25 = vld [vmem:[%s2575_s11 + $0x28] sm:$0xff]  }
 0x233   :  { %1969 = vrcp.f32 %v933_v28  ;;  %v1857_v28 = vld [vmem:[%s2575_s11 + $0x30] sm:$0xff]  }
 0x234   :  { %1971 = vpow2.f32 %v920_v2  ;;  %v1855_v2 = vld [vmem:[%s2575_s11 + $0x20] sm:$0xff]  }
 0x235   :  { %1973 = vpow2.f32 %v916_v4  ;;  %1695 = vmatpush3.bf16.msra.mxu0 %v975_v61  ;;  %v1858_v4 = vld [vmem:[%s2575_s11 + $0x38] sm:$0xff]  }
 0x236   :  { %1975 = vpow2.f32 %v922_v30  ;;  %1696 = vmatprep.subr.bf16.mxu0 %v2019_v13 }
 0x237   :  { %1977 = vpow2.f32 %v918_v20  ;;  %v1482_v20 = vld [vmem:[%s2574_s10] ss:$0 sm:$0xff]  ;;  %s2021_s10 = smov [#allocation3]  }
 0x238   :  { %s1395_s21 = sshll.u32 %s2021_s10, 4  ;;  %s1396_s21 = int_to_ptr.vmem [resolvable:$true] %s1395_s21 }
 0x239   :  { %p2000_p1 = scmp.lt.s32.totalorder %s1396_s21, %s1396_s21 }
 0x23a   :  { %v1964_v33 = vpop.eup %1963 }
 0x23b   :  { %v1966_v5 = vpop.eup %1965  ;;  %v966_v11 = vmul.f32 %v1964_v33, %v2415_v8 }
 0x23c   :  { %v1968_v9 = vpop.eup %1967  ;;  %v964_v59 = vmul.f32 %v1966_v5, %v2418_v51 }
 0x23d   :  { %v1970_v10 = vpop.eup %1969  ;;  %v967_v38 = vmul.f32 %v1968_v9, %v2422_v17  ;;  %v980_v17 = vlaneseq }
 0x23e   :  { %v1972_v12 = vpop.eup %1971  ;;  %v965_v14 = vmul.f32 %v1970_v10, %v2426_v40 }
 0x23f   :  { %v1974_v15 = vpop.eup %1973  ;;  %v977_v16 = vpack.c.bf16 %v967_v38, %v966_v11  ;;  %v938_v18 = vadd.f32 1.0, %v1972_v12  ;;  %v981_v34 = vshrl.u32 %v980_v17, 7 }
 0x240   :  { %v1976_v19 = vpop.eup %1975  ;;  %v976_v22 = vpack.c.bf16 %v965_v14, %v964_v59  ;;  %v936_v23 = vadd.f32 1.0, %v1974_v15 }
 0x241   :  { %v1978_v24 = vpop.eup %1977  ;;  %1979 = vrcp.f32 %v938_v18  ;;  %v939_v46 = vadd.f32 1.0, %v1976_v19  ;;  %vm987_vm1 = vcmp.eq.s32.totalorder %v981_v34, %v1461_v36  ;;  %v1483_v18 = vld [vmem:[%s2576_s12] ss:$0 sm:$0xff]  ;;  %s1995_s12 = scalar_lea.vmem %s1396_s21, 128 }
 0x242   :  { %1981 = vrcp.f32 %v936_v23  ;;  %v937_v26 = vadd.f32 1.0, %v1978_v24  ;;  %1697 = vmatpush3.bf16.msra.mxu0 %v976_v22  ;;  %vm1463_vm2 = vmpackc.low %vm987_vm1, %vm987_vm1  ;;  %p1996_p0 = scmp.ne.s32.totalorder %s1396_s21, %s1995_s12  ;;  %p2001_p2 = scmp.lt.s32.totalorder %s1995_s12, %s1995_s12 }
 0x243   :  { %1983 = vrcp.f32 %v939_v46  ;;  %1698 = vmatprep.subr.bf16.mxu0 %v2019_v13 }
 0x244   :  { %1985 = vrcp.f32 %v937_v26  ;;  %p2002_p3 = por %p2001_p2, %p2000_p1 }
 0x246   :  { %1699 = vmatpush3.bf16.msra.mxu0 %v977_v16  ;;  %p2003_p4 = pnand %p2002_p3, %p1996_p0 }
 0x247   :  { %1700 = vmatprep.subr.bf16.mxu0 %v2019_v13 }
 0x24b   :  { %v1980_v8 = vpop.eup %1979 }
 0x24c   :  { %v1982_v51 = vpop.eup %1981  ;;  %v970_v29 = vmul.f32 %v1980_v8, %v2433_v7  ;;  %v1836_v7 = vld [vmem:[%s2572_s8] sm:$0xff]  }
 0x24d   :  { %v1984_v40 = vpop.eup %1983  ;;  %v968_v31 = vmul.f32 %v1982_v51, %v2438_v47  ;;  %v1846_v47 = vld [vmem:[%s2572_s8 + $0x28] sm:$0xff]  }
 0x24e   :  { %v1986_v27 = vpop.eup %1985  ;;  %v971_v60 = vmul.f32 %v1984_v40, %v2444_v6 }
 0x24f   :  { %v969_v32 = vmul.f32 %v1986_v27, %v865_v56 }
 0x250   :  { %v979_v1 = vpack.c.bf16 %v971_v60, %v970_v29 }
 0x251   :  { %v978_v35 = vpack.c.bf16 %v969_v32, %v968_v31 }
 0x253   :  { %1701 = vmatpush3.bf16.msra.mxu0 %v978_v35 }
 0x254   :  { %1702 = vmatprep.subr.bf16.mxu0 %v2019_v13 }
 0x257   :  { %1703 = vmatpush3.bf16.msra.mxu0 %v979_v1 }
 0x258   :  { %1728 = vmatprep.subr.bf16.mxu0 %v2019_v13 }
 0x25a   :  { %1705 = vmatmul.mubr.msk.bf16.vlgmr.msra.gmra.mrb[32].mxu0 %vm1463_vm2, %v1464_v39 }
 0x25b   :  { %1729 = vmatpush3.bf16.msra.mxu0 %v1836_v7  ;;  %1744 = vmatprep.mubr.msk.bf16.mxu0 %vm2020_vm0, %v2019_v13 }
 0x25c   :  { %1730 = vmatprep.subr.bf16.mxu0 %v2019_v13 }
 0x25f   :  { %1731 = vmatpush3.bf16.msra.mxu0 %v1838_v41 }
 0x260   :  { %1732 = vmatprep.subr.bf16.mxu0 %v2019_v13 }
 0x263   :  { %1733 = vmatpush3.bf16.msra.mxu0 %v1840_v37 }
 0x264   :  { %1734 = vmatprep.subr.bf16.mxu0 %v2019_v13 }
 0x267   :  { %1735 = vmatpush3.bf16.msra.mxu0 %v1842_v44 }
 0x268   :  { %1736 = vmatprep.subr.bf16.mxu0 %v2019_v13 }
 0x26b   :  { %1737 = vmatpush3.bf16.msra.mxu0 %v1844_v42 }
 0x26c   :  { %1738 = vmatprep.subr.bf16.mxu0 %v2019_v13 }
 0x26f   :  { %1739 = vmatpush3.bf16.msra.mxu0 %v1846_v47 }
 0x270   :  { %1740 = vmatprep.subr.bf16.mxu0 %v2019_v13 }
 0x273   :  { %1741 = vmatpush3.bf16.msra.mxu0 %v1848_v48 }
 0x274   :  { %1742 = vmatprep.subr.bf16.mxu0 %v2019_v13 }
 0x277   :  { %1743 = vmatpush3.bf16.msra.mxu0 %v1850_v49 }
 0x27a   :  { %1745 = vmatmul.mubr.bf16.vlgmr.msra.gmra.mrb[36].mxu0 %v1044_v58 }
 0x32d   :  { %v1032_v6 = vpop.f32.mrb[32].mxu0 }
 0x32e   :  { %v1062_v52 = vpack.c.bf16 %v1032_v6, %v1032_v6  ;;  %v1706_v54 = vpop.f32.mrb[33].mxu0 }
 0x32f   :  { %v1035_v61 = vpop.f32.mrb[34].mxu0 }
 0x330   :  { %1725 = vmatmul.mubr.bf16.vlgmr.msra.gmra.mrb[32].mxu1 %v1062_v52  ;;  %v1707_v43 = vpop.f32.mrb[35].mxu0 }
 0x331   :  { %1764 = vmatprep.mubr.msk.bf16.mxu1 %vm2020_vm0, %v2019_v13  ;;  %1749 = vmatpush3.bf16.msra.mxu1 %v1851_v21 }
 0x332   :  { %1750 = vmatprep.subr.bf16.mxu1 %v2019_v13 }
 0x335   :  { %1751 = vmatpush3.bf16.msra.mxu1 %v1852_v45 }
 0x336   :  { %1752 = vmatprep.subr.bf16.mxu1 %v2019_v13 }
 0x339   :  { %1753 = vmatpush3.bf16.msra.mxu1 %v1853_v0 }
 0x33a   :  { %1754 = vmatprep.subr.bf16.mxu1 %v2019_v13 }
 0x33d   :  { %1755 = vmatpush3.bf16.msra.mxu1 %v1854_v53 }
 0x33e   :  { %1756 = vmatprep.subr.bf16.mxu1 %v2019_v13 }
 0x341   :  { %1757 = vmatpush3.bf16.msra.mxu1 %v1855_v2 }
 0x342   :  { %1758 = vmatprep.subr.bf16.mxu1 %v2019_v13 }
 0x345   :  { %1759 = vmatpush3.bf16.msra.mxu1 %v1856_v25 }
 0x346   :  { %1760 = vmatprep.subr.bf16.mxu1 %v2019_v13 }
 0x349   :  { %1761 = vmatpush3.bf16.msra.mxu1 %v1857_v28 }
 0x34a   :  { %1762 = vmatprep.subr.bf16.mxu1 %v2019_v13 }
 0x34d   :  { %v1249_v50 = vpop.f32.mrb[36].mxu0  ;;  %1763 = vmatpush3.bf16.msra.mxu1 %v1858_v4 }
 0x34e   :  { %v1746_v56 = vpop.f32.mrb[37].mxu0 }
 0x34f   :  { %v1252_v57 = vpop.f32.mrb[38].mxu0 }
 0x350   :  { %v1747_v62 = vpop.f32.mrb[39].mxu0 }
 0x403   :  { %v1161_v30 = vpop.f32.mrb[32].mxu1 }
 0x404   :  { %v1250_v33 = vadd.f32 %v1249_v50, %v1161_v30  ;;  %v1726_v5 = vpop.f32.mrb[33].mxu1 }
 0x405   :  { %v1164_v9 = vpop.f32.mrb[34].mxu1 }
 0x406   :  { %v1262_v10 = vadd.f32 %v1482_v20, %v1250_v33  ;;  %v1727_v11 = vpop.f32.mrb[35].mxu1 }
 0x408   :  { %v1263_v38 = vsub.f32 0.0, %v1262_v10 }
 0x40a   :  { %v1264_v12 = vmul.f32 1.442695, %v1263_v38 }
 0x40c   :  { %1987 = vpow2.f32 %v1264_v12 }
 0x416   :  { %v1988_v59 = vpop.eup %1987 }
 0x417   :  { %v1266_v13 = vadd.f32 1.0, %v1988_v59 }
 0x419   :  { %1989 = vrcp.f32 %v1266_v13 }
 0x423   :  { %v1990_v14 = vpop.eup %1989 }
 0x424   :  { %v1268_v15 = vmul.f32 %v1990_v14, %v1262_v10 }
 0x426   :  { %v1269_v16 = vpack.c.bf16 %v1268_v15, %v1268_v15 }
 0x428   :  { %1765 = vmatmul.mubr.bf16.vlgmr.msra.gmra.mrb[36].mxu1 %v1269_v16 }
 0x4fb   :  { %v1375_v19 = vpop.f32.mrb[36].mxu1 }
 0x4fc   :  { %v1376_v22 = vadd.f32 %v1483_v18, %v1375_v19  ;;  %v1766_v23 = vpop.f32.mrb[37].mxu1 }
 0x4fd   :  { %v1378_v24 = vpop.f32.mrb[38].mxu1 }
 0x4fe   :  { %v1381_v46 = vsub.f32 0.0, %v1376_v22  ;;  %v1767_v26 = vpop.f32.mrb[39].mxu1 }
 0x500   :  { %v1382_v8 = vmul.f32 1.442695, %v1381_v46 }
 0x502   :  { %1991 = vpow2.f32 %v1382_v8 }
 0x50c   :  { %v1992_v51 = vpop.eup %1991 }
 0x50d   :  { %v1384_v17 = vadd.f32 1.0, %v1992_v51 }
 0x50f   :  { %1993 = vrcp.f32 %v1384_v17 }
 0x519   :  { %v1994_v40 = vpop.eup %1993 }
 0x51a   :  { %v1386_v27 = vmul.f32 %v1994_v40, %v1376_v22 }
 0x51c   :  { %v1387_v29 = vadd.f32 %v1386_v27, %v2504_v63 }
 0x51e   :  { %1388 = vst [vmem:[#allocation3] sm:$0xff] %v1387_v29 }
 0x51f   :  { %2006 = shalt.err (!%p2003_p4)
}
 0x520   :  { %s2007_s23 = scalar_lea.hbm %s2577_s13, 128 }
 0x521   :  { %p2008_p5 = scmp.ne.s32.totalorder %s2577_s13, %s2007_s23  ;;  %p2011_p6 = scmp.lt.u32.totalorder %s2007_s23, %s2577_s13 }
 0x523   :  { %p2013_p7 = pnand %p2011_p6, %p2008_p5 }
 0x525   :  { %2016 = shalt.err (!%p2013_p7)
}
 0x526   :  { %1398 = dma.vmem_to_hbm [thread:$0]  %s1396_s21, 128, %s2577_s13, [#allocation4]  }
 0x527   :  { %2017 = dma.done.wait [#allocation4], 128  }
 0x528   :  { %2018 = vsyncadd [#allocation4], 4294967168 }
 0x529   :  { %1402 = vsyncpa [#allocation4], 1 }

</bundles_post_ra>
